<compile_context>
chip_gen: v7x
topology: tpu7x:2x2x1
jax: 0.10.0
libtpu: 0.0.40
codegen_flags: <defaults>
</compile_context>

<pallas_src>
import numpy as np

import jax
import jax.numpy as jnp
from jax.experimental import pallas as pl
from jax.experimental.pallas import tpu as pltpu


def _round_up(x, m):
    return ((x + m - 1) // m) * m


# ----------------------------------------------------------------------------
# Fused kernel: one conv-stem GEMM + bias + ReLU + (masked GAP matmul) + head
# ----------------------------------------------------------------------------
def _fused_kernel(x_ref, w_ref, pool_ref, bstem_ref, whead_ref, bhead_ref, o_ref):
    # x_ref:     (1, Bb*ROWS, Kp)   bf16  — merged-tap conv LHS for Bb batches
    # w_ref:     (Kp, ODF)          bf16  — merged conv-stem weight (K-padded)
    # pool_ref:  (Bb, Bb*ROWS)      f32   — block-diag (valid-mask / S) pooling
    # bstem_ref: (1, ODF)           f32
    # whead_ref: (ODF, NCp)         bf16  — head weight, tiled over od, padded
    # bhead_ref: (1, NCp)           f32
    # o_ref:     (1, Bb, NCp)       f32
    acc = jnp.dot(x_ref[0], w_ref[...], preferred_element_type=jnp.float32)
    h = jnp.maximum(acc + bstem_ref[...], 0.0)               # (Bb*ROWS, ODF)
    # GAP + row-validity mask folded into one (block-diagonal) MXU matmul.
    pooled = jnp.dot(pool_ref[...], h, preferred_element_type=jnp.float32)
    logits = jnp.dot(pooled.astype(jnp.bfloat16), whead_ref[...],
                     preferred_element_type=jnp.float32) + bhead_ref[...]
    o_ref[0, :, :] = logits


# ----------------------------------------------------------------------------
# Weight repack (tiny, trace-time): fold (kh, kw, kd) taps into one dense K
# ----------------------------------------------------------------------------
def _build_merged_weight(w_stem, D, Kp):
    """w_stem: (F0, C, 3, 3, 3) with spatial order (kh, kw, kd) ~ (H, W, D).

    Returns (Kp, OD*F0) with entry
      [(kh*3 + kw)*DPC + (2*od + kd)*C + c, od*F0 + f] = w_stem[f, c, kh, kw, kd]
    and zeros elsewhere (including the K padding rows).
    """
    F0, C = w_stem.shape[0], w_stem.shape[1]
    OD = D // 2
    DPC = (D + 2) * C
    # indicator[dd, od, kd] = 1 iff dd == 2*od + kd
    dd = np.arange(D + 2)[:, None, None]
    od = np.arange(OD)[None, :, None]
    kd = np.arange(3)[None, None, :]
    ind = jnp.asarray((dd == 2 * od + kd).astype(np.float32))     # (D+2, OD, 3)
    w9 = jnp.transpose(w_stem, (2, 3, 4, 1, 0)).reshape(9, 3, C, F0)
    W = jnp.einsum("dok,tkcf->tdcof", ind, w9,
                   precision=jax.lax.Precision.HIGHEST)            # (9,D+2,C,OD,F0)
    W = W.reshape(9 * DPC, OD * F0)
    return jnp.pad(W, ((0, Kp - 9 * DPC), (0, 0)))


# ----------------------------------------------------------------------------
# Forward pass
# ----------------------------------------------------------------------------
def rsna24_keypoint_3d_forward(x, params, *, max_batch_block=8):
    """x: (B, C, D, H, W) float32 (PyTorch NCDHW). Returns (B, num_classes)."""
    B, C, D, H, W = x.shape
    assert H % 2 == 0 and W % 2 == 0 and D % 2 == 0, "even spatial dims expected"
    F0 = params["w_stem"].shape[0]
    NC = params["w_head"].shape[1]

    OH, OW, OD = H // 2, W // 2, D // 2
    DPC = (D + 2) * C                       # padded-depth * channels per tap
    K = 9 * DPC                             # merged-tap contraction depth
    Kp = _round_up(K, 128)                  # lane-dense K (exactly 128 here)
    ODF = OD * F0                           # accumulator lane width (128 here)
    NCp = _round_up(NC, 128)                # lane-dense logits
    ROWS = _round_up(OH * OW, 16)           # bf16 sublane pack (16 rows)

    # Batch blocking: Bb elements per grid step; keep >= 2 steps (v7x has 2 TCs).
    Bb = max(1, min(max_batch_block, (B + 1) // 2))
    grid_b = -(-B // Bb)
    Bpad = grid_b * Bb
    MROWS = Bb * ROWS

    # ---- merged-tap LHS (lane-dense, built once in the wrapper) -------------
    # module permute (B,C,D,H,W)->(B,C,H,W,D), then channel-last + zero pad.
    x_cl = jnp.transpose(x, (0, 3, 4, 2, 1))                    # (B,H,W,D,C)
    xp = jnp.pad(x_cl, ((0, 0), (1, 1), (1, 1), (1, 1), (0, 0)))
    xp = xp.reshape(B, H + 2, W + 2, DPC)                       # flatten (D+2,C)
    taps = [xp[:, kh:kh + 2 * OH:2, kw:kw + 2 * OW:2, :]        # (B,OH,OW,DPC)
            for kh in range(3) for kw in range(3)]
    lhs = jnp.concatenate(taps, axis=-1).reshape(B, OH * OW, K)
    lhs = jnp.pad(lhs, ((0, Bpad - B), (0, ROWS - OH * OW), (0, Kp - K)))
    lhs = lhs.astype(jnp.bfloat16).reshape(grid_b, MROWS, Kp)

    # ---- tiny parameter repacks (trace time) ---------------------------------
    w_merged = _build_merged_weight(params["w_stem"], D, Kp).astype(jnp.bfloat16)
    bstem_big = jnp.tile(params["b_stem"].reshape(1, F0), (1, OD))      # (1,ODF)
    whead_big = jnp.pad(jnp.tile(params["w_head"], (OD, 1)),
                        ((0, 0), (0, NCp - NC))).astype(jnp.bfloat16)   # (ODF,NCp)
    bhead = jnp.pad(params["b_head"].reshape(1, NC), ((0, 0), (0, NCp - NC)))

    # Block-diagonal pooling matrix: 1/(OH*OW*OD) on valid rows, 0 on padding.
    pool_np = np.zeros((Bb, MROWS), np.float32)
    row_valid = np.zeros((ROWS,), np.float32)
    row_valid[:OH * OW] = 1.0 / float(OH * OW * OD)
    for i in range(Bb):
        pool_np[i, i * ROWS:(i + 1) * ROWS] = row_valid
    pool = jnp.asarray(pool_np)

    out = pl.pallas_call(
        _fused_kernel,
        out_shape=jax.ShapeDtypeStruct((grid_b, Bb, NCp), jnp.float32),
        grid_spec=pltpu.PrefetchScalarGridSpec(
            num_scalar_prefetch=0,
            grid=(grid_b,),
            in_specs=[
                pl.BlockSpec((1, MROWS, Kp), lambda b: (b, 0, 0)),
                pl.BlockSpec((Kp, ODF), lambda b: (0, 0)),
                pl.BlockSpec((Bb, MROWS), lambda b: (0, 0)),
                pl.BlockSpec((1, ODF), lambda b: (0, 0)),
                pl.BlockSpec((ODF, NCp), lambda b: (0, 0)),
                pl.BlockSpec((1, NCp), lambda b: (0, 0)),
            ],
            out_specs=pl.BlockSpec((1, Bb, NCp), lambda b: (b, 0, 0)),
        ),
        compiler_params=pltpu.CompilerParams(
            dimension_semantics=("parallel",),
        ),
    )(lhs, w_merged, pool, bstem_big, whead_big, bhead)

    return out.reshape(Bpad, NCp)[:B, :NC]


# ----------------------------------------------------------------------------
# Parameters + pure-JAX reference (for a correctness check)
# ----------------------------------------------------------------------------
def make_params(key, in_chans=1, stem_feats=32, num_classes=30):
    k1, k2, k3, k4 = jax.random.split(key, 4)
    fan_in = in_chans * 27
    w_stem = jax.random.normal(
        k1, (stem_feats, in_chans, 3, 3, 3), jnp.float32) / jnp.sqrt(fan_in)
    b_stem = 0.01 * jax.random.normal(k2, (stem_feats,), jnp.float32)
    w_head = jax.random.normal(
        k3, (stem_feats, num_classes), jnp.float32) / jnp.sqrt(stem_feats)
    b_head = 0.01 * jax.random.normal(k4, (num_classes,), jnp.float32)
    return {"w_stem": w_stem, "b_stem": b_stem,
            "w_head": w_head, "b_head": b_head}


def reference_forward(x, params):
    """Pure-JAX reference of the stand-in net (GEMM operands bf16-rounded)."""
    w = params["w_stem"].astype(jnp.bfloat16).astype(jnp.float32)
    xc = jnp.transpose(x, (0, 1, 3, 4, 2))            # module permute
    xc = xc.astype(jnp.bfloat16).astype(jnp.float32)
    y = jax.lax.conv_general_dilated(
        xc, w, window_strides=(2, 2, 2), padding=((1, 1),) * 3,
        dimension_numbers=("NCDHW", "OIDHW", "NCDHW"),
        precision=jax.lax.Precision.HIGHEST)
    y = jnp.maximum(y + params["b_stem"].reshape(1, -1, 1, 1, 1), 0.0)
    pooled = jnp.mean(y, axis=(2, 3, 4))
    wh = params["w_head"].astype(jnp.bfloat16).astype(jnp.float32)
    return (jnp.dot(pooled, wh, precision=jax.lax.Precision.HIGHEST)
            + params["b_head"])


if __name__ == "__main__":
    key = jax.random.PRNGKey(0)
    kx, kp = jax.random.split(key)

    # small shapes: B=2, C_in=1, D=8 (slices), H=W=16
    B, C_in, D, H, W = 2, 1, 8, 16, 16
    x = jax.random.normal(kx, (B, C_in, D, H, W), jnp.float32)
    params = make_params(kp, in_chans=C_in, stem_feats=32, num_classes=30)

    fwd = jax.jit(rsna24_keypoint_3d_forward)
    out = fwd(x, params)
    jax.block_until_ready(out)

    assert out.shape == (B, 30), out.shape
    assert out.dtype == jnp.float32

    ref = reference_forward(x, params)
    err = float(jnp.max(jnp.abs(out - ref)))
    assert err < 2e-2, f"mismatch vs reference: max abs err = {err}"
    print("KERNEL_OK")
</pallas_src>

<mosaic_0001>
module attributes {stable_mosaic.version = 11 : i64} {
  func.func @_fused_kernel(%arg0: i32, %arg1: memref<1x64x128xbf16, #tpu.memory_space<vmem>>, %arg2: memref<128x128xbf16, #tpu.memory_space<vmem>>, %arg3: memref<1x64xf32, #tpu.memory_space<vmem>>, %arg4: memref<1x128xf32, #tpu.memory_space<vmem>>, %arg5: memref<128x128xbf16, #tpu.memory_space<vmem>>, %arg6: memref<1x128xf32, #tpu.memory_space<vmem>>, %arg7: memref<1x1x128xf32, #tpu.memory_space<vmem>>) attributes {dimension_semantics = [#tpu.dimension_semantics<parallel>], iteration_bounds = array<i64: 2>, scalar_prefetch = 0 : i64, scratch_operands = 0 : i64, tpu.core_type = #tpu.core_type<tc>, window_params = [{transform_indices = @transform_0, window_bounds = array<i64: 1, 64, 128>}, {pipeline_mode = #tpu.pipeline_mode<synchronous>, transform_indices = @transform_1, window_bounds = array<i64: 128, 128>}, {pipeline_mode = #tpu.pipeline_mode<synchronous>, transform_indices = @transform_2, window_bounds = array<i64: 1, 64>}, {pipeline_mode = #tpu.pipeline_mode<synchronous>, transform_indices = @transform_3, window_bounds = array<i64: 1, 128>}, {pipeline_mode = #tpu.pipeline_mode<synchronous>, transform_indices = @transform_4, window_bounds = array<i64: 128, 128>}, {pipeline_mode = #tpu.pipeline_mode<synchronous>, transform_indices = @transform_5, window_bounds = array<i64: 1, 128>}, {transform_indices = @transform_6, window_bounds = array<i64: 1, 1, 128>}]} {
    %c0 = arith.constant 0 : index
    %c0_0 = arith.constant 0 : index
    %c0_1 = arith.constant 0 : index
    %0 = vector.load %arg1[%c0, %c0_0, %c0_1] : memref<1x64x128xbf16, #tpu.memory_space<vmem>>, vector<1x64x128xbf16>
    %1 = vector.shape_cast %0 : vector<1x64x128xbf16> to vector<64x128xbf16>
    %c0_2 = arith.constant 0 : index
    %c0_3 = arith.constant 0 : index
    %2 = vector.load %arg2[%c0_2, %c0_3] : memref<128x128xbf16, #tpu.memory_space<vmem>>, vector<128x128xbf16>
    %cst = arith.constant dense<0.000000e+00> : vector<64x128xf32>
    %3 = tpu.matmul %1, %2, %cst {dimension_numbers = #tpu.dot_dimension_numbers<[1], [0], [0], [1], [0, 0, 1, 1], [], []>} : vector<64x128xbf16>, vector<128x128xbf16>, vector<64x128xf32> -> vector<64x128xf32>
    %c0_4 = arith.constant 0 : index
    %c0_5 = arith.constant 0 : index
    %4 = vector.load %arg4[%c0_4, %c0_5] : memref<1x128xf32, #tpu.memory_space<vmem>>, vector<1x128xf32>
    %5 = vector.broadcast %4 : vector<1x128xf32> to vector<64x128xf32>
    %6 = arith.addf %3, %5 : vector<64x128xf32>
    %cst_6 = arith.constant 0.000000e+00 : f32
    %7 = vector.broadcast %cst_6 : f32 to vector<64x128xf32>
    %8 = arith.maximumf %6, %7 : vector<64x128xf32>
    %c0_7 = arith.constant 0 : index
    %c0_8 = arith.constant 0 : index
    %9 = vector.load %arg3[%c0_7, %c0_8] : memref<1x64xf32, #tpu.memory_space<vmem>>, vector<1x64xf32>
    %cst_9 = arith.constant dense<0.000000e+00> : vector<1x128xf32>
    %10 = tpu.matmul %9, %8, %cst_9 {dimension_numbers = #tpu.dot_dimension_numbers<[1], [0], [0], [1], [0, 0, 1, 1], [], []>} : vector<1x64xf32>, vector<64x128xf32>, vector<1x128xf32> -> vector<1x128xf32>
    %11 = arith.truncf %10 : vector<1x128xf32> to vector<1x128xbf16>
    %c0_10 = arith.constant 0 : index
    %c0_11 = arith.constant 0 : index
    %12 = vector.load %arg5[%c0_10, %c0_11] : memref<128x128xbf16, #tpu.memory_space<vmem>>, vector<128x128xbf16>
    %cst_12 = arith.constant dense<0.000000e+00> : vector<1x128xf32>
    %13 = tpu.matmul %11, %12, %cst_12 {dimension_numbers = #tpu.dot_dimension_numbers<[1], [0], [0], [1], [0, 0, 1, 1], [], []>} : vector<1x128xbf16>, vector<128x128xbf16>, vector<1x128xf32> -> vector<1x128xf32>
    %c0_13 = arith.constant 0 : index
    %c0_14 = arith.constant 0 : index
    %14 = vector.load %arg6[%c0_13, %c0_14] : memref<1x128xf32, #tpu.memory_space<vmem>>, vector<1x128xf32>
    %15 = arith.addf %13, %14 : vector<1x128xf32>
    %c0_15 = arith.constant 0 : index
    %c0_16 = arith.constant 0 : index
    %c0_17 = arith.constant 0 : index
    %16 = vector.load %arg7[%c0_15, %c0_16, %c0_17] : memref<1x1x128xf32, #tpu.memory_space<vmem>>, vector<1x1x128xf32>
    %17 = vector.shape_cast %16 : vector<1x1x128xf32> to vector<1x128xf32>
    %18 = vector.shape_cast %15 : vector<1x128xf32> to vector<1x1x128xf32>
    tpu.vector_store %arg7[%c0_15, %c0_16, %c0_17], %18 {strides = array<i32>} : memref<1x1x128xf32, #tpu.memory_space<vmem>>, vector<1x1x128xf32>,
    return
  }
  func.func @transform_0(%arg0: i32) -> (i32, i32, i32) {
    %c0_i32 = arith.constant 0 : i32
    %c0_i32_0 = arith.constant 0 : i32
    %c0_i32_1 = arith.constant 0 : i32
    return %arg0, %c0_i32, %c0_i32_0 : i32, i32, i32
  }
  func.func @transform_1(%arg0: i32) -> (i32, i32) {
    %c0_i32 = arith.constant 0 : i32
    %c0_i32_0 = arith.constant 0 : i32
    %c0_i32_1 = arith.constant 0 : i32
    return %c0_i32, %c0_i32_0 : i32, i32
  }
  func.func @transform_2(%arg0: i32) -> (i32, i32) {
    %c0_i32 = arith.constant 0 : i32
    %c0_i32_0 = arith.constant 0 : i32
    %c0_i32_1 = arith.constant 0 : i32
    return %c0_i32, %c0_i32_0 : i32, i32
  }
  func.func @transform_3(%arg0: i32) -> (i32, i32) {
    %c0_i32 = arith.constant 0 : i32
    %c0_i32_0 = arith.constant 0 : i32
    %c0_i32_1 = arith.constant 0 : i32
    return %c0_i32, %c0_i32_0 : i32, i32
  }
  func.func @transform_4(%arg0: i32) -> (i32, i32) {
    %c0_i32 = arith.constant 0 : i32
    %c0_i32_0 = arith.constant 0 : i32
    %c0_i32_1 = arith.constant 0 : i32
    return %c0_i32, %c0_i32_0 : i32, i32
  }
  func.func @transform_5(%arg0: i32) -> (i32, i32) {
    %c0_i32 = arith.constant 0 : i32
    %c0_i32_0 = arith.constant 0 : i32
    %c0_i32_1 = arith.constant 0 : i32
    return %c0_i32, %c0_i32_0 : i32, i32
  }
  func.func @transform_6(%arg0: i32) -> (i32, i32, i32) {
    %c0_i32 = arith.constant 0 : i32
    %c0_i32_0 = arith.constant 0 : i32
    %c0_i32_1 = arith.constant 0 : i32
    return %arg0, %c0_i32, %c0_i32_0 : i32, i32, i32
  }
}

</mosaic_0001>

<bundles_post_ra>
// kernel: rsna24_keypoint_3d_forward.1
= control target key start
LH: loop header
LB: loop body
LE: loop exit
PB: predicated region body
PF: predicated region fallthrough
CT: control target
= control target key end

     0   :  { %11 = vsyncpa [#allocation3], 0  ;;  %s1135_s0 = inlined_call_operand.vmem [shape: bf16[2,64,128], index: 0, kind: input, shape index: {}]   ;;  %s1136_s1 = inlined_call_operand.vmem [shape: bf16[128,128], index: 1, kind: input, shape index: {}]   ;;  %s1137_s2 = inlined_call_operand.vmem [shape: f32[1,64], index: 2, kind: input, shape index: {}]   ;;  %s1138_s3 = inlined_call_operand.vmem [shape: f32[1,128], index: 3, kind: input, shape index: {}]   ;;  %s1139_s4 = inlined_call_operand.vmem [shape: bf16[128,128], index: 4, kind: input, shape index: {}]   ;;  %s1140_s5 = inlined_call_operand.vmem [shape: f32[1,128], index: 5, kind: input, shape index: {}]   ;;  %s1141_s6 = inlined_call_operand.hbm [shape: f32[2,1,128], index: 6, kind: output, shape index: {}]  }
   0x1   :  { %13 = vsyncpa [#allocation3 + $0x1], 0  ;;  %s978_s21 = smov 0   ;;  %s980_s22 = smov 0  }
   0x2   :  { %s982_s23 = smov 0   ;;  %s984_s24 = smov 0  }
   0x3 LB: > { %s999_s25 = sadd.s32 4294967295, %s937_s24   ;;  %s676_s26 = sadd.s32 4294967294, %s937_s24   ;;  %s937_s24 = sphi %s984_s24, %s1147_s24   ;;  %s933_s23 = sphi %s982_s23, %s1146_s23   ;;  %s929_s22 = sphi %s980_s22, %s1145_s22   ;;  %s925_s21 = sphi %s978_s21, %s1144_s21  }
   0x4   : > { %s1003_s27 = sadd.s32 1, %s937_s24   ;;  %s157_s28 = sadd.s32 1, %s933_s23 }
   0x5   : > { %s154_s29 = ssub.s32 %s937_s24, %s1003_s27  ;;  %p167_p0 = scmp.ne.s32.totalorder %s933_s23, %s929_s22 }
   0x6   : > { %p155_p1 = scmp.eq.s32.totalorder %s154_s29, 0  ;;  %p168_p2 = scmp.eq.s32.totalorder %s999_s25, 1 }
   0x7   : > { %p173_p3 = scmp.ne.s32.totalorder %s929_s22, %s925_s21  ;;  %p174_p4 = scmp.eq.s32.totalorder %s676_s26, 1 }
   0x8   : > { %s1014_s30 = scalar_select %p155_p1, %s933_s23, %s157_s28  }
   0x9   : > { %p1016_p5 = por %p168_p2, %p167_p0  ;;  %p1020_p6 = por %p174_p4, %p173_p3 }
   0xa   : > { %p679_p7 = scmp.ge.s32.totalorder %s937_s24, 1  ;;  %p215_p8 = scmp.lt.s32.totalorder %s937_s24, 3 }
   0xc   : > { %p216_p9 = pnand %p679_p7, %p215_p8 }
   0xd   : > { %v855_v0 = vld [vmem:[%s1136_s1] sm:$0xff] (!%p216_p9)   ;;  %p244_p10 = scmp.lt.s32.totalorder (!%p216_p9), %s999_s25, 1  ;;  %v856_v1 = vld [vmem:[%s1136_s1 + $0x8] sm:$0xff] (!%p216_p9)   ;;  %v857_v2 = vld [vmem:[%s1136_s1 + $0x10] sm:$0xff] (!%p216_p9)   ;;  %v939_v12 = vmov (!%p216_p9), 0.0|0.0   ;;  %vm940_vm0 = vmmov (!%p216_p9), 0  }
   0xe   : > { %219 = sbr.rel (%p216_p9) target bundleno = 724 (0x2d4), region = 44  ;;  %738 = vmatprep.subr.bf16.mxu0 (!%p216_p9), %v855_v0  ;;  %v858_v3 = vld [vmem:[%s1136_s1 + $0x18] sm:$0xff] (!%p216_p9)   ;;  %v859_v5 = vld [vmem:[%s1136_s1 + $0x20] sm:$0xff] (!%p216_p9)   ;;  %v860_v6 = vld [vmem:[%s1136_s1 + $0x28] sm:$0xff] (!%p216_p9)   ;;  %v941_v13 = vmov (!%p216_p9), 0.0   ;;  %vm427_vm1 = vcmask (!%p216_p9), 523264  }
   0xf   : > { %739 = vmatpush3.bf16.msra.mxu0 (!%p216_p9), %v855_v0  ;;  %v861_v7 = vld [vmem:[%s1136_s1 + $0x30] sm:$0xff] (!%p216_p9)   ;;  %v862_v8 = vld [vmem:[%s1136_s1 + $0x38] sm:$0xff] (!%p216_p9)   ;;  %781 = vmatprep.subr.bf16.mxu1 (!%p216_p9), %v941_v13  ;;  %v867_v14 = vld [vmem:[%s1139_s4] sm:$0xff] (!%p216_p9)   ;;  %s242_s20 = sand.u32 (!%p216_p9), 1, %s929_s22   ;;  %s704_s29 = sshll.u32 (!%p216_p9), %s999_s25, 4 }
  0x10   : > { %740 = vmatprep.subr.bf16.mxu0 (!%p216_p9), %v856_v1  ;;  %797 = vmatprep.mubr.msk.bf16.mxu1 (!%p216_p9), %vm940_vm0, %v941_v13  ;;  %v868_v15 = vld [vmem:[%s1139_s4 + $0x8] sm:$0xff] (!%p216_p9)   ;;  %v869_v16 = vld [vmem:[%s1139_s4 + $0x10] sm:$0xff] (!%p216_p9)   ;;  %v870_v17 = vld [vmem:[%s1139_s4 + $0x18] sm:$0xff] (!%p216_p9)   ;;  %s243_s9 = scalar_lea.vmem (!%p216_p9), [#allocation2], %s242_s20  ;;  %s609_s14 = scalar_lea.sflag (!%p216_p9), [#allocation3], %s242_s20 }
  0x11   : > { %782 = vmatpush3.bf16.msra.mxu1 (!%p216_p9), %v867_v14  ;;  %v871_v18 = vld [vmem:[%s1139_s4 + $0x20] sm:$0xff] (!%p216_p9)   ;;  %v872_v19 = vld [vmem:[%s1139_s4 + $0x28] sm:$0xff] (!%p216_p9)   ;;  %v873_v20 = vld [vmem:[%s1139_s4 + $0x30] sm:$0xff] (!%p216_p9)   ;;  %s621_s10 = sshll.u32 (!%p216_p9), %s243_s9, 4  ;;  %s942_s15 = smov (!%p216_p9), [#allocation2]   ;;  %s1095_s10 = int_to_ptr.vmem [resolvable:$true] %s621_s10 }
  0x12   : > { %783 = vmatprep.subr.bf16.mxu1 (!%p216_p9), %v941_v13  ;;  %v682_v21 = vld [vmem:[%s1138_s3] ss:$0 sm:$0xff] (!%p216_p9)  ;;  %v874_v51 = vld [vmem:[%s1139_s4 + $0x38] sm:$0xff] (!%p216_p9)  }
  0x13   : > { %741 = vmatpush3.bf16.msra.mxu0 (!%p216_p9), %v856_v1  ;;  %v426_v50 = vld [vmem:[%s1137_s2] sm:$0x1] (!%p216_p9) }
  0x14   : > { %742 = vmatprep.subr.bf16.mxu0 (!%p216_p9), %v857_v2  ;;  %v518_v55 = vld [vmem:[%s1140_s5] sm:$0x1] (!%p216_p9) }
  0x15   : > { %s245_s13 = scalar_select %p244_p10, %s999_s25, 1  ;;  %784 = vmatpush3.bf16.msra.mxu1 %v868_v15 }
  0x16   : > { %785 = vmatprep.subr.bf16.mxu1 %v941_v13  ;;  %s875_s25 = scalar_lea.vmem %s1095_s10, 16 }
  0x17   : > { %s707_s16 = sshll.u32 %s245_s13, 5  ;;  %743 = vmatpush3.bf16.msra.mxu0 %v857_v2  ;;  %s1093_s13 = scalar_lea.hbm %s1141_s6, %s704_s29 }
  0x18   : > { %s248_s19 = scalar_lea.vmem %s1135_s0, %s707_s16  ;;  %744 = vmatprep.subr.bf16.mxu0 %v858_v3  ;;  %p876_p11 = scmp.ne.s32.totalorder %s1095_s10, %s875_s25 }
  0x19   : > { %v863_v4 = vld [vmem:[%s248_s19] sm:$0xff]   ;;  %v864_v9 = vld [vmem:[%s248_s19 + $0x8] sm:$0xff]   ;;  %v865_v10 = vld [vmem:[%s248_s19 + $0x10] sm:$0xff]   ;;  %786 = vmatpush3.bf16.msra.mxu1 %v869_v16  ;;  %s879_s16 = sshll.u32 %s942_s15, 4  ;;  %s880_s16 = int_to_ptr.vmem [resolvable:$false] %s879_s16 }
  0x1a   : > { %754 = vmatprep.mubr.bf16.mxu0 %v863_v4  ;;  %v866_v11 = vld [vmem:[%s248_s19 + $0x18] sm:$0xff]   ;;  %787 = vmatprep.subr.bf16.mxu1 %v941_v13  ;;  %p877_p12 = pnand %p876_p11, %p1016_p5  ;;  %s881_s17 = scalar_lea.vmem %s880_s16, 32 }
  0x1b   : > { %745 = vmatpush3.bf16.msra.mxu0 %v858_v3  ;;  %p882_p0 = scmp.lt.s32.totalorder %s1095_s10, %s880_s16  ;;  %p883_p1 = scmp.lt.s32.totalorder %s881_s17, %s875_s25 }
  0x1c   : > { %746 = vmatprep.subr.bf16.mxu0 %v859_v5  ;;  %p878_p13 = pneg %p877_p12 }
  0x1d   : > { %788 = vmatpush3.bf16.msra.mxu1 %v870_v17  ;;  %p884_p2 = por %p883_p1, %p882_p0 }
  0x1e   : > { %789 = vmatprep.subr.bf16.mxu1 %v941_v13 }
  0x1f   : > { %747 = vmatpush3.bf16.msra.mxu0 %v859_v5  ;;  %p885_p3 = pnand %p884_p2, %p878_p13 }
  0x20   : > { %748 = vmatprep.subr.bf16.mxu0 %v860_v6 }
  0x21   : > { %790 = vmatpush3.bf16.msra.mxu1 %v871_v18 }
  0x22   : > { %791 = vmatprep.subr.bf16.mxu1 %v941_v13 }
  0x23   : > { %749 = vmatpush3.bf16.msra.mxu0 %v860_v6 }
  0x24   : > { %750 = vmatprep.subr.bf16.mxu0 %v861_v7 }
  0x25   : > { %792 = vmatpush3.bf16.msra.mxu1 %v872_v19 }
  0x26   : > { %793 = vmatprep.subr.bf16.mxu1 %v941_v13 }
  0x27   : > { %751 = vmatpush3.bf16.msra.mxu0 %v861_v7 }
  0x28   : > { %752 = vmatprep.subr.bf16.mxu0 %v862_v8 }
  0x29   : > { %794 = vmatpush3.bf16.msra.mxu1 %v873_v20 }
  0x2a   : > { %795 = vmatprep.subr.bf16.mxu1 %v941_v13 }
  0x2b   : > { %753 = vmatpush3.bf16.msra.mxu0 %v862_v8 }
  0x2c   : > { %801 = vmatprep.subr.bf16.mxu0 %v939_v12 }
  0x2d   : > { %796 = vmatpush3.bf16.msra.mxu1 %v874_v51 }
  0x2e   : > { %755 = vmatmul.mubr.bf16.vlgmr.msra.gmra.mrb[0].mxu0 %v864_v9 }
  0x2f   : > { %758 = vmatprep.mubr.bf16.mxu0 %v865_v10 }
  0x36   : > { %759 = vmatmul.mubr.bf16.gmra.mrb[4].mxu0 %v866_v11 }
  0x37   : > { %778 = vmatprep.mubr.msk.f32.mxu0 %vm940_vm0, %v941_v13 }
 0x101   : > { %v756_v22 = vpop.f32.mrb[0].mxu0 }
 0x102   : > { %v396_v23 = vadd.f32 %v756_v22, %v682_v21  ;;  %v387_v24 = vpop.f32.mrb[1].mxu0 }
 0x103   : > { %v388_v25 = vadd.f32 %v682_v21, %v387_v24  ;;  %v757_v26 = vpop.f32.mrb[2].mxu0 }
 0x104   : > { %v399_v27 = vadd.f32 %v757_v26, %v682_v21  ;;  %v390_v28 = vpop.f32.mrb[3].mxu0  ;;  %v420_v30 = vmax.f32 %v396_v23, 0.0 }
 0x105   : > { %v391_v29 = vadd.f32 %v682_v21, %v390_v28  ;;  %v418_v32 = vmax.f32 %v388_v25, 0.0 }
 0x106   : > { %v421_v31 = vmax.f32 %v399_v27, 0.0 }
 0x107   : > { %v419_v33 = vmax.f32 %v391_v29, 0.0 }
 0x108   : > { %v805_v34 = vpack.c.bf16 %v421_v31, %v420_v30 }
 0x109   : > { %v802_v35 = vpack.c.bf16 %v419_v33, %v418_v32  ;;  %v760_v36 = vpop.f32.mrb[4].mxu0 }
 0x10a   : > { %v412_v37 = vadd.f32 %v760_v36, %v682_v21  ;;  %v403_v38 = vpop.f32.mrb[5].mxu0 }
 0x10b   : > { %v404_v39 = vadd.f32 %v682_v21, %v403_v38  ;;  %v761_v40 = vpop.f32.mrb[6].mxu0  ;;  %803 = vmatpush3.bf16.msra.mxu0 %v802_v35 }
 0x10c   : > { %v415_v41 = vadd.f32 %v761_v40, %v682_v21  ;;  %v406_v42 = vpop.f32.mrb[7].mxu0  ;;  %804 = vmatprep.subr.bf16.mxu0 %v939_v12  ;;  %v424_v44 = vmax.f32 %v412_v37, 0.0 }
 0x10d   : > { %v407_v43 = vadd.f32 %v682_v21, %v406_v42  ;;  %v422_v46 = vmax.f32 %v404_v39, 0.0 }
 0x10e   : > { %v425_v45 = vmax.f32 %v415_v41, 0.0 }
 0x10f   : > { %v423_v47 = vmax.f32 %v407_v43, 0.0  ;;  %806 = vmatpush3.bf16.msra.mxu0 %v805_v34 }
 0x110   : > { %v811_v48 = vpack.c.bf16 %v425_v45, %v424_v44  ;;  %807 = vmatprep.subr.bf16.mxu0 %v939_v12 }
 0x111   : > { %v808_v49 = vpack.c.bf16 %v423_v47, %v422_v46 }
 0x113   : > { %809 = vmatpush3.bf16.msra.mxu0 %v808_v49 }
 0x114   : > { %810 = vmatprep.subr.bf16.mxu0 %v939_v12 }
 0x117   : > { %812 = vmatpush3.bf16.msra.mxu0 %v811_v48 }
 0x11a   : > { %779 = vmatmul.mubr.msk.f32.vlgmr.msra.gmra.mrb[8].mxu0 %vm427_vm1, %v426_v50 }
 0x1ed   : > { %v497_v52 = vpop.f32.mrb[8].mxu0 }
 0x1ee   : > { %v501_v53 = vpack.c.bf16 %v497_v52, %v497_v52  ;;  %v780_v54 = vpop.f32.mrb[9].mxu0 }
 0x1f0   : > { %798 = vmatmul.mubr.bf16.vlgmr.msra.gmra.mrb[0].mxu1 %v501_v53 }
 0x2c3   : > { %v601_v56 = vpop.f32.mrb[0].mxu1 }
 0x2c4   : > { %v602_v57 = vadd.f32 %v601_v56, %v518_v55  ;;  %v799_v58 = vpop.f32.mrb[1].mxu1 }
 0x2c5   : > { %v604_v59 = vpop.f32.mrb[2].mxu1 }
 0x2c6   : > { %607 = vst [vmem:[%s243_s9] sm:$0x1] %v602_v57  ;;  %v800_v60 = vpop.f32.mrb[3].mxu1 }
 0x2c7   : > { %888 = shalt.err (!%p885_p3)
}
 0x2c8   : > { %s889_s18 = scalar_lea.hbm %s1093_s13, 16  ;;  %s893_s26 = scalar_lea.hbm %s1141_s6, 32 }
 0x2c9   : > { %p890_p4 = scmp.ne.s32.totalorder %s1093_s13, %s889_s18  ;;  %p894_p9 = scmp.lt.u32.totalorder %s1093_s13, %s1141_s6 }
 0x2ca   : > { %p895_p10 = scmp.lt.u32.totalorder %s893_s26, %s889_s18  ;;  %p897_p12 = scmp.lt.u32.totalorder %s889_s18, %s1093_s13 }
 0x2cb   : > { %p891_p7 = pnand %p890_p4, %p1016_p5 }
 0x2cc   : > { %p896_p11 = por %p895_p10, %p894_p9 }
 0x2cd   : > { %p892_p8 = pneg %p891_p7 }
 0x2ce   : > { %p898_p13 = por %p897_p12, %p896_p11 }
 0x2d0   : > { %p899_p0 = pnand %p898_p13, %p892_p8 }
 0x2d2   : > { %902 = shalt.err (!%p899_p0)
}
 0x2d3   : > { %813 = dma.vmem_to_hbm [thread:$0]  (%p1016_p5), %s1095_s10, 16, %s1093_s13, %s609_s14  }
 0x2d4 PF: > { %p819_p1 = scmp.ge.s32.totalorder %s937_s24, 2  ;;  %s633_s9 = sand.u32 1, %s925_s21  }
 0x2d5   : > { %s634_s11 = scalar_lea.sflag [#allocation3], %s633_s9 }
 0x2d6   : > { %p816_p2 = pnand %p819_p1, %p1020_p6 }
 0x2d8   : > { %920 = dma.done.wait (!%p816_p2), %s634_s11, 16  }
 0x2d9   : > { %922 = vsyncadd (!%p816_p2), %s634_s11, 4294967280  ;;  %p16_p3 = scmp.ge.s32.totalorder %s1003_s27, 4   ;;  %s1144_s21 = smov %s929_s22 }
 0x2da   : > { %s1145_s22 = smov %s933_s23  ;;  %s1146_s23 = smov %s1014_s30 }
 0x2db   : > { %s1147_s24 = smov %s1003_s27  ;;  %18 = sbr.rel (!%p16_p3) target bundleno = 3 (0x3), region = 79 }
 0x2e2   :  { %638 = vsyncpa [#allocation3], 1 }
 0x2e3   :  { %640 = vsyncpa [#allocation3 + $0x1], 1 }

</bundles_post_ra>
